<compile_context>
chip_gen: v7x
topology: tpu7x:2x2x1
jax: 0.10.0
libtpu: 0.0.40
codegen_flags: <defaults>
</compile_context>

<pallas_src>
import functools

import jax
import jax.numpy as jnp
from jax.experimental import pallas as pl
from jax.experimental.pallas import tpu as pltpu


def _round_up(x, m):
    return (x + m - 1) // m * m


def _cdiv(a, b):
    return -(-a // b)


# ----------------------------------------------------------------------------
# Fused kernel: stem conv (as GEMM) + BN + SiLU + GAP accumulator + head GEMMs
# ----------------------------------------------------------------------------
def _fused_kernel(patches_ref, w_ref, scale_ref, bias_ref,
                  w1_ref, b1_ref, w2_ref, b2_ref,
                  o_ref, acc_ref, *, hw_valid, hw_padded):
    i = pl.program_id(1)                                   # spatial-tile (reduction) axis

    @pl.when(i == 0)
    def _init():
        acc_ref[...] = jnp.zeros_like(acc_ref)

    # Stem conv as one GEMM on the whole [t, K] tile (batch handled by the parallel
    # grid axis, so no Python batch loop and a single accumulator update per step).
    y = jnp.dot(patches_ref[0], w_ref[...],
                preferred_element_type=jnp.float32)        # [t, C0p] f32
    y = y * scale_ref[...] + bias_ref[...]                 # folded BatchNorm
    y = y * jax.nn.sigmoid(y)                              # SiLU
    acc_ref[...] += jnp.sum(y, axis=0, keepdims=True)      # partial spatial sum [1, C0p]

    @pl.when(i == pl.num_programs(1) - 1)
    def _finalize():
        acc = acc_ref[...]
        if hw_padded > hw_valid:                           # static (trace-time) branch
            # Zero-padded patch rows contribute exactly silu(bias) per channel, so
            # subtract that analytically instead of masking rows on every tile.
            bias = bias_ref[...]
            acc = acc - float(hw_padded - hw_valid) * (bias * jax.nn.sigmoid(bias))
        feats = acc * (1.0 / hw_valid)                     # global average pool [1, C0p]
        # Linear(C0 -> 128) -> Dropout(0.1) [identity in eval] -> Linear(128 -> class_num)
        h = jnp.dot(feats, w1_ref[...], preferred_element_type=jnp.float32) + b1_ref[...]
        out = jnp.dot(h, w2_ref[...], preferred_element_type=jnp.float32) + b2_ref[...]
        o_ref[...] = out.reshape(o_ref.shape)              # single lane-dense store


# ----------------------------------------------------------------------------
# JAX glue: layout / im2col (compute stays in the Pallas kernel)
# ----------------------------------------------------------------------------
def _im2col_3x3_s2_p1(image_nchw, dtype):
    """3x3 stride-2 pad-1 conv patches, PyTorch output-size formula."""
    B, Cin, H, W = image_nchw.shape
    x = jnp.transpose(image_nchw, (0, 2, 3, 1)).astype(dtype)   # NHWC, cast early (1 pass)
    x = jnp.pad(x, ((0, 0), (1, 1), (1, 1), (0, 0)))
    Ho = (H + 2 - 3) // 2 + 1
    Wo = (W + 2 - 3) // 2 + 1
    cols = []
    for kh in range(3):
        for kw in range(3):
            cols.append(x[:, kh:kh + 2 * (Ho - 1) + 1:2,
                          kw:kw + 2 * (Wo - 1) + 1:2, :])
    patches = jnp.stack(cols, axis=3)                           # [B, Ho, Wo, 9, Cin]
    return patches.reshape(B, Ho * Wo, 9 * Cin), Ho, Wo


def pet_categor_extract_forward(image_nchw, params, *, tile_hw=4096):
    """image_nchw: [B, 3, H, W] float32 (PyTorch layout)."""
    B = image_nchw.shape[0]
    patches, _, _ = _im2col_3x3_s2_p1(image_nchw, jnp.bfloat16)  # bf16 halves HBM traffic
    HW, K = patches.shape[1], patches.shape[2]

    stem_w = params["stem_w"]              # [K, C0]
    C0 = stem_w.shape[1]
    H1 = params["w1"].shape[1]
    Cn = params["w2"].shape[1]

    # lane-dense padded widths (zero-padded channels stay exactly zero end-to-end)
    C0p = _round_up(C0, 128)
    H1p = _round_up(H1, 128)
    Cnp = _round_up(Cn, 128)

    w_p = jnp.zeros((K, C0p), jnp.float32).at[:, :C0].set(stem_w).astype(jnp.bfloat16)
    scale_p = jnp.zeros((1, C0p), jnp.float32).at[:, :C0].set(params["bn_scale"])
    bias_p = jnp.zeros((1, C0p), jnp.float32).at[:, :C0].set(params["bn_bias"])
    w1_p = jnp.zeros((C0p, H1p), jnp.float32).at[:C0, :H1].set(params["w1"])
    b1_p = jnp.zeros((1, H1p), jnp.float32).at[:, :H1].set(params["b1"])
    w2_p = jnp.zeros((H1p, Cnp), jnp.float32).at[:H1, :Cn].set(params["w2"])
    b2_p = jnp.zeros((1, Cnp), jnp.float32).at[:, :Cn].set(params["b2"])

    # Pick the number of spatial tiles first, then size the tile to minimize padding
    # (e.g. 224x224 -> HW=12544 -> 4 tiles of 3136 rows, zero padding).
    cap = max(16, min(tile_hw, HW))
    n_tiles = _cdiv(HW, cap)
    t = _round_up(_cdiv(HW, n_tiles), 16)
    n_tiles = _cdiv(HW, t)
    HWp = n_tiles * t
    if HWp > HW:
        patches = jnp.pad(patches, ((0, 0), (0, HWp - HW), (0, 0)))

    kernel = functools.partial(_fused_kernel, hw_valid=HW, hw_padded=HWp)
    out_p = pl.pallas_call(
        kernel,
        out_shape=jax.ShapeDtypeStruct((B, 1, Cnp), jnp.float32),
        grid=(B, n_tiles),
        in_specs=[
            pl.BlockSpec((1, t, K), lambda b, i: (b, i, 0)),   # streamed patch tiles
            pl.BlockSpec((K, C0p), lambda b, i: (0, 0)),       # resident stem weight (bf16)
            pl.BlockSpec((1, C0p), lambda b, i: (0, 0)),       # BN scale
            pl.BlockSpec((1, C0p), lambda b, i: (0, 0)),       # BN bias
            pl.BlockSpec((C0p, H1p), lambda b, i: (0, 0)),     # head w1
            pl.BlockSpec((1, H1p), lambda b, i: (0, 0)),       # head b1
            pl.BlockSpec((H1p, Cnp), lambda b, i: (0, 0)),     # head w2
            pl.BlockSpec((1, Cnp), lambda b, i: (0, 0)),       # head b2
        ],
        out_specs=pl.BlockSpec((1, 1, Cnp), lambda b, i: (b, 0, 0)),  # written once per b
        scratch_shapes=[pltpu.VMEM((1, C0p), jnp.float32)],    # per-core GAP accumulator
        compiler_params=pltpu.CompilerParams(
            dimension_semantics=("parallel", "arbitrary"),     # batch || , spatial reduce
            vmem_limit_bytes=32 * 1024 * 1024),
    )(patches, w_p, scale_p, bias_p, w1_p, b1_p, w2_p, b2_p)

    out = out_p[:, 0, :Cn]
    if Cn == 1:
        out = jnp.squeeze(out, axis=1)     # matches PyTorch x.squeeze(1) semantics
    return out


# ----------------------------------------------------------------------------
# Pure-JAX reference (f32) for numeric sanity check
# ----------------------------------------------------------------------------
def _reference_forward(image_nchw, params):
    patches, _, _ = _im2col_3x3_s2_p1(image_nchw, jnp.float32)
    y = jnp.einsum("bpk,kc->bpc", patches, params["stem_w"])
    y = y * params["bn_scale"] + params["bn_bias"]
    y = y * jax.nn.sigmoid(y)
    feats = jnp.mean(y, axis=1)
    h = feats @ params["w1"] + params["b1"]
    out = h @ params["w2"] + params["b2"]
    if out.shape[1] == 1:
        out = jnp.squeeze(out, axis=1)
    return out


def init_params(key, in_chans=3, stem_ch=32, hidden=128, class_num=1):
    kh = kw = 3
    ks = jax.random.split(key, 6)
    feat = stem_ch  # stand-in for efficientnet_b0 classifier.in_features (=1280)
    return {
        # stem conv weight stored as [kh*kw*Cin, Cout] to match im2col patch layout
        "stem_w": jax.random.normal(ks[0], (kh * kw * in_chans, stem_ch), jnp.float32) * 0.1,
        "bn_scale": jnp.ones((1, stem_ch), jnp.float32),
        "bn_bias": jnp.zeros((1, stem_ch), jnp.float32),
        "w1": jax.random.normal(ks[1], (feat, hidden), jnp.float32) * 0.05,
        "b1": jax.random.normal(ks[2], (1, hidden), jnp.float32) * 0.01,
        "w2": jax.random.normal(ks[3], (hidden, class_num), jnp.float32) * 0.05,
        "b2": jax.random.normal(ks[4], (1, class_num), jnp.float32) * 0.01,
    }


if __name__ == "__main__":
    key = jax.random.PRNGKey(0)
    k_img, k_par = jax.random.split(key)

    B, Cin, H, W = 2, 3, 32, 32
    class_num = 1
    image = jax.random.normal(k_img, (B, Cin, H, W), jnp.float32)
    params = init_params(k_par, in_chans=Cin, class_num=class_num)

    ref = _reference_forward(image, params)

    # 1) small tile -> multi-step accumulator path with a zero-padded final tile
    #    (exercises the analytic silu(bias) correction and the batch-parallel axis).
    out = jax.block_until_ready(pet_categor_extract_forward(image, params, tile_hw=96))
    assert out.shape == (B,), f"unexpected output shape {out.shape}"
    assert jnp.allclose(out, ref, rtol=5e-2, atol=1e-2), (out, ref)

    # 2) production default (large tiles -> single grid step per image here).
    out2 = jax.block_until_ready(pet_categor_extract_forward(image, params))
    assert out2.shape == (B,), f"unexpected output shape {out2.shape}"
    assert jnp.allclose(out2, ref, rtol=5e-2, atol=1e-2), (out2, ref)

    print("KERNEL_OK")
</pallas_src>

<mosaic_0001>
module attributes {stable_mosaic.version = 11 : i64} {
  func.func @_fused_kernel(%arg0: i32, %arg1: i32, %arg2: memref<1x96x27xbf16, #tpu.memory_space<vmem>>, %arg3: memref<27x128xbf16, #tpu.memory_space<vmem>>, %arg4: memref<1x128xf32, #tpu.memory_space<vmem>>, %arg5: memref<1x128xf32, #tpu.memory_space<vmem>>, %arg6: memref<128x128xf32, #tpu.memory_space<vmem>>, %arg7: memref<1x128xf32, #tpu.memory_space<vmem>>, %arg8: memref<128x128xf32, #tpu.memory_space<vmem>>, %arg9: memref<1x128xf32, #tpu.memory_space<vmem>>, %arg10: memref<1x1x128xf32, #tpu.memory_space<vmem>>, %arg11: memref<1x128xf32, #tpu.memory_space<vmem>>) attributes {dimension_semantics = [#tpu.dimension_semantics<parallel>, #tpu.dimension_semantics<arbitrary>], iteration_bounds = array<i64: 2, 3>, scalar_prefetch = 0 : i64, scratch_operands = 1 : i64, tpu.core_type = #tpu.core_type<tc>, window_params = [{transform_indices = @transform_0, window_bounds = array<i64: 1, 96, 27>}, {pipeline_mode = #tpu.pipeline_mode<synchronous>, transform_indices = @transform_1, window_bounds = array<i64: 27, 128>}, {pipeline_mode = #tpu.pipeline_mode<synchronous>, transform_indices = @transform_2, window_bounds = array<i64: 1, 128>}, {pipeline_mode = #tpu.pipeline_mode<synchronous>, transform_indices = @transform_3, window_bounds = array<i64: 1, 128>}, {pipeline_mode = #tpu.pipeline_mode<synchronous>, transform_indices = @transform_4, window_bounds = array<i64: 128, 128>}, {pipeline_mode = #tpu.pipeline_mode<synchronous>, transform_indices = @transform_5, window_bounds = array<i64: 1, 128>}, {pipeline_mode = #tpu.pipeline_mode<synchronous>, transform_indices = @transform_6, window_bounds = array<i64: 128, 128>}, {pipeline_mode = #tpu.pipeline_mode<synchronous>, transform_indices = @transform_7, window_bounds = array<i64: 1, 128>}, {transform_indices = @transform_8, window_bounds = array<i64: 1, 1, 128>}]} {
    %c0_i32 = arith.constant 0 : i32
    %0 = arith.cmpi eq, %arg1, %c0_i32 : i32
    %1 = arith.extui %0 : i1 to i32
    %c0_i32_0 = arith.constant 0 : i32
    %2 = arith.cmpi ne, %1, %c0_i32_0 : i32
    scf.if %2 {
      %cst_16 = arith.constant 0.000000e+00 : f32
      %27 = vector.broadcast %cst_16 : f32 to vector<1x128xf32>
      %c0_17 = arith.constant 0 : index
      %c0_18 = arith.constant 0 : index
      %28 = vector.load %arg11[%c0_17, %c0_18] : memref<1x128xf32, #tpu.memory_space<vmem>>, vector<1x128xf32>
      tpu.vector_store %arg11[%c0_17, %c0_18], %27 {strides = array<i32>} : memref<1x128xf32, #tpu.memory_space<vmem>>, vector<1x128xf32>,
    } else {
    }
    %c0 = arith.constant 0 : index
    %c0_1 = arith.constant 0 : index
    %c0_2 = arith.constant 0 : index
    %3 = vector.load %arg2[%c0, %c0_1, %c0_2] : memref<1x96x27xbf16, #tpu.memory_space<vmem>>, vector<1x96x27xbf16>
    %4 = vector.shape_cast %3 : vector<1x96x27xbf16> to vector<96x27xbf16>
    %c0_3 = arith.constant 0 : index
    %c0_4 = arith.constant 0 : index
    %5 = vector.load %arg3[%c0_3, %c0_4] : memref<27x128xbf16, #tpu.memory_space<vmem>>, vector<27x128xbf16>
    %cst = arith.constant dense<0.000000e+00> : vector<96x128xf32>
    %6 = tpu.matmul %4, %5, %cst {dimension_numbers = #tpu.dot_dimension_numbers<[1], [0], [0], [1], [0, 0, 1, 1], [], []>} : vector<96x27xbf16>, vector<27x128xbf16>, vector<96x128xf32> -> vector<96x128xf32>
    %c0_5 = arith.constant 0 : index
    %c0_6 = arith.constant 0 : index
    %7 = vector.load %arg4[%c0_5, %c0_6] : memref<1x128xf32, #tpu.memory_space<vmem>>, vector<1x128xf32>
    %8 = vector.broadcast %7 : vector<1x128xf32> to vector<96x128xf32>
    %9 = arith.mulf %6, %8 : vector<96x128xf32>
    %c0_7 = arith.constant 0 : index
    %c0_8 = arith.constant 0 : index
    %10 = vector.load %arg5[%c0_7, %c0_8] : memref<1x128xf32, #tpu.memory_space<vmem>>, vector<1x128xf32>
    %11 = vector.broadcast %10 : vector<1x128xf32> to vector<96x128xf32>
    %12 = arith.addf %9, %11 : vector<96x128xf32>
    %13 = arith.negf %12 : vector<96x128xf32>
    %14 = math.exp %13 : vector<96x128xf32>
    %cst_9 = arith.constant 1.000000e+00 : f32
    %15 = vector.broadcast %cst_9 : f32 to vector<96x128xf32>
    %16 = arith.addf %15, %14 : vector<96x128xf32>
    %17 = arith.divf %15, %16 : vector<96x128xf32>
    %18 = arith.mulf %12, %17 : vector<96x128xf32>
    %c0_10 = arith.constant 0 : index
    %c0_11 = arith.constant 0 : index
    %19 = vector.load %arg11[%c0_10, %c0_11] : memref<1x128xf32, #tpu.memory_space<vmem>>, vector<1x128xf32>
    %cst_12 = arith.constant dense<0.000000e+00> : vector<128xf32>
    %20 = vector.multi_reduction <add>, %18, %cst_12 [0] : vector<96x128xf32> to vector<128xf32>
    %21 = vector.shape_cast %20 : vector<128xf32> to vector<1x128xf32>
    %22 = arith.addf %19, %21 : vector<1x128xf32>
    %c0_13 = arith.constant 0 : index
    %c0_14 = arith.constant 0 : index
    %23 = vector.load %arg11[%c0_13, %c0_14] : memref<1x128xf32, #tpu.memory_space<vmem>>, vector<1x128xf32>
    tpu.vector_store %arg11[%c0_13, %c0_14], %22 {strides = array<i32>} : memref<1x128xf32, #tpu.memory_space<vmem>>, vector<1x128xf32>,
    %c2_i32 = arith.constant 2 : i32
    %24 = arith.cmpi eq, %arg1, %c2_i32 : i32
    %25 = arith.extui %24 : i1 to i32
    %c0_i32_15 = arith.constant 0 : i32
    %26 = arith.cmpi ne, %25, %c0_i32_15 : i32
    scf.if %26 {
      %c0_16 = arith.constant 0 : index
      %c0_17 = arith.constant 0 : index
      %27 = vector.load %arg11[%c0_16, %c0_17] : memref<1x128xf32, #tpu.memory_space<vmem>>, vector<1x128xf32>
      %c0_18 = arith.constant 0 : index
      %c0_19 = arith.constant 0 : index
      %28 = vector.load %arg5[%c0_18, %c0_19] : memref<1x128xf32, #tpu.memory_space<vmem>>, vector<1x128xf32>
      %29 = arith.negf %28 : vector<1x128xf32>
      %30 = math.exp %29 : vector<1x128xf32>
      %cst_20 = arith.constant 1.000000e+00 : f32
      %31 = vector.broadcast %cst_20 : f32 to vector<1x128xf32>
      %32 = arith.addf %31, %30 : vector<1x128xf32>
      %33 = arith.divf %31, %32 : vector<1x128xf32>
      %34 = arith.mulf %28, %33 : vector<1x128xf32>
      %cst_21 = arith.constant 3.200000e+01 : f32
      %35 = vector.broadcast %cst_21 : f32 to vector<1x128xf32>
      %36 = arith.mulf %35, %34 : vector<1x128xf32>
      %37 = arith.subf %27, %36 : vector<1x128xf32>
      %cst_22 = arith.constant 3.906250e-03 : f32
      %38 = vector.broadcast %cst_22 : f32 to vector<1x128xf32>
      %39 = arith.mulf %37, %38 : vector<1x128xf32>
      %c0_23 = arith.constant 0 : index
      %c0_24 = arith.constant 0 : index
      %40 = vector.load %arg6[%c0_23, %c0_24] : memref<128x128xf32, #tpu.memory_space<vmem>>, vector<128x128xf32>
      %cst_25 = arith.constant dense<0.000000e+00> : vector<1x128xf32>
      %41 = tpu.matmul %39, %40, %cst_25 {dimension_numbers = #tpu.dot_dimension_numbers<[1], [0], [0], [1], [0, 0, 1, 1], [], []>} : vector<1x128xf32>, vector<128x128xf32>, vector<1x128xf32> -> vector<1x128xf32>
      %c0_26 = arith.constant 0 : index
      %c0_27 = arith.constant 0 : index
      %42 = vector.load %arg7[%c0_26, %c0_27] : memref<1x128xf32, #tpu.memory_space<vmem>>, vector<1x128xf32>
      %43 = arith.addf %41, %42 : vector<1x128xf32>
      %c0_28 = arith.constant 0 : index
      %c0_29 = arith.constant 0 : index
      %44 = vector.load %arg8[%c0_28, %c0_29] : memref<128x128xf32, #tpu.memory_space<vmem>>, vector<128x128xf32>
      %cst_30 = arith.constant dense<0.000000e+00> : vector<1x128xf32>
      %45 = tpu.matmul %43, %44, %cst_30 {dimension_numbers = #tpu.dot_dimension_numbers<[1], [0], [0], [1], [0, 0, 1, 1], [], []>} : vector<1x128xf32>, vector<128x128xf32>, vector<1x128xf32> -> vector<1x128xf32>
      %c0_31 = arith.constant 0 : index
      %c0_32 = arith.constant 0 : index
      %46 = vector.load %arg9[%c0_31, %c0_32] : memref<1x128xf32, #tpu.memory_space<vmem>>, vector<1x128xf32>
      %47 = arith.addf %45, %46 : vector<1x128xf32>
      %48 = vector.shape_cast %47 : vector<1x128xf32> to vector<1x1x128xf32>
      %c0_33 = arith.constant 0 : index
      %c0_34 = arith.constant 0 : index
      %c0_35 = arith.constant 0 : index
      %49 = vector.load %arg10[%c0_33, %c0_34, %c0_35] : memref<1x1x128xf32, #tpu.memory_space<vmem>>, vector<1x1x128xf32>
      tpu.vector_store %arg10[%c0_33, %c0_34, %c0_35], %48 {strides = array<i32>} : memref<1x1x128xf32, #tpu.memory_space<vmem>>, vector<1x1x128xf32>,
    } else {
    }
    return
  }
  func.func @transform_0(%arg0: i32, %arg1: i32) -> (i32, i32, i32) {
    %c0_i32 = arith.constant 0 : i32
    %c0_i32_0 = arith.constant 0 : i32
    return %arg0, %arg1, %c0_i32 : i32, i32, i32
  }
  func.func @transform_1(%arg0: i32, %arg1: i32) -> (i32, i32) {
    %c0_i32 = arith.constant 0 : i32
    %c0_i32_0 = arith.constant 0 : i32
    %c0_i32_1 = arith.constant 0 : i32
    return %c0_i32, %c0_i32_0 : i32, i32
  }
  func.func @transform_2(%arg0: i32, %arg1: i32) -> (i32, i32) {
    %c0_i32 = arith.constant 0 : i32
    %c0_i32_0 = arith.constant 0 : i32
    %c0_i32_1 = arith.constant 0 : i32
    return %c0_i32, %c0_i32_0 : i32, i32
  }
  func.func @transform_3(%arg0: i32, %arg1: i32) -> (i32, i32) {
    %c0_i32 = arith.constant 0 : i32
    %c0_i32_0 = arith.constant 0 : i32
    %c0_i32_1 = arith.constant 0 : i32
    return %c0_i32, %c0_i32_0 : i32, i32
  }
  func.func @transform_4(%arg0: i32, %arg1: i32) -> (i32, i32) {
    %c0_i32 = arith.constant 0 : i32
    %c0_i32_0 = arith.constant 0 : i32
    %c0_i32_1 = arith.constant 0 : i32
    return %c0_i32, %c0_i32_0 : i32, i32
  }
  func.func @transform_5(%arg0: i32, %arg1: i32) -> (i32, i32) {
    %c0_i32 = arith.constant 0 : i32
    %c0_i32_0 = arith.constant 0 : i32
    %c0_i32_1 = arith.constant 0 : i32
    return %c0_i32, %c0_i32_0 : i32, i32
  }
  func.func @transform_6(%arg0: i32, %arg1: i32) -> (i32, i32) {
    %c0_i32 = arith.constant 0 : i32
    %c0_i32_0 = arith.constant 0 : i32
    %c0_i32_1 = arith.constant 0 : i32
    return %c0_i32, %c0_i32_0 : i32, i32
  }
  func.func @transform_7(%arg0: i32, %arg1: i32) -> (i32, i32) {
    %c0_i32 = arith.constant 0 : i32
    %c0_i32_0 = arith.constant 0 : i32
    %c0_i32_1 = arith.constant 0 : i32
    return %c0_i32, %c0_i32_0 : i32, i32
  }
  func.func @transform_8(%arg0: i32, %arg1: i32) -> (i32, i32, i32) {
    %c0_i32 = arith.constant 0 : i32
    %c0_i32_0 = arith.constant 0 : i32
    %c0_i32_1 = arith.constant 0 : i32
    return %arg0, %c0_i32, %c0_i32_0 : i32, i32, i32
  }
}

</mosaic_0001>

<bundles_post_ra>
// kernel: tpu_custom_call.1
= control target key start
LH: loop header
LB: loop body
LE: loop exit
PB: predicated region body
PF: predicated region fallthrough
CT: control target
= control target key end

     0   :  { %13 = vsyncpa [#allocation4], 0  ;;  %s1759_s0 = inlined_call_operand.vmem [shape: bf16[2,288,27], index: 0, kind: input, shape index: {}]   ;;  %s1760_s1 = inlined_call_operand.vmem [shape: bf16[27,128], index: 1, kind: input, shape index: {}]   ;;  %s1761_s2 = inlined_call_operand.vmem [shape: f32[1,128], index: 2, kind: input, shape index: {}]   ;;  %s1762_s3 = inlined_call_operand.vmem [shape: f32[1,128], index: 3, kind: input, shape index: {}]   ;;  %s1763_s4 = inlined_call_operand.vmem [shape: f32[128,128], index: 4, kind: input, shape index: {}]   ;;  %s1764_s5 = inlined_call_operand.vmem [shape: f32[1,128], index: 5, kind: input, shape index: {}]   ;;  %s1765_s6 = inlined_call_operand.vmem [shape: f32[128,128], index: 6, kind: input, shape index: {}]   ;;  %s1766_s7 = inlined_call_operand.vmem [shape: f32[1,128], index: 7, kind: input, shape index: {}]   ;;  %s1767_s8 = inlined_call_operand.hbm [shape: f32[2,1,128], index: 8, kind: output, shape index: {}]  }
   0x1   :  { %15 = vsyncpa [#allocation4 + $0x1], 0  ;;  %s1423_s27 = smov 0   ;;  %s1425_s28 = smov 0  }
   0x2   :  { %s1427_s29 = smov 0   ;;  %s1429_s30 = smov 0  }
   0x3   :  { %s1431_s9 = smov 0   ;;  %s1433_s10 = smov 0  }
   0x4   :  { %s1435_s11 = smov 0   ;;  %s1437_s12 = smov 0  }
   0x5 LB: > { %1770 = sst [smem:[#allocation6_spill]] %s1366_s11  ;;  %s919_s13 = sadd.s32 4294967295, %s1370_s12   ;;  %s1370_s12 = sphi %s1437_s12, %s21_s12   ;;  %s1366_s11 = sphi %s1435_s11, %s1777_s11   ;;  %s1362_s10 = sphi %s1433_s10, %s1782_s10   ;;  %s1358_s9 = sphi %s1431_s9, %s1775_s9   ;;  %s1354_s30 = sphi %s1429_s30, %s1781_s30   ;;  %s1350_s29 = sphi %s1427_s29, %s1780_s29   ;;  %s1346_s28 = sphi %s1425_s28, %s1779_s28   ;;  %s1342_s27 = sphi %s1423_s27, %s1778_s27  }
   0x6   : > { %s920_s14 = sadd.s32 4294967294, %s1370_s12   ;;  %s30_s15 = sadd.s32 1, %s1362_s10 }
   0x7   : > { %p31_p0 = scmp.ge.s32.totalorder %s30_s15, 3  ;;  %s33_s16 = sadd.s32 1, %s1366_s11 }
   0x8   : > { %p225_p1 = scmp.ne.s32.totalorder %s1350_s29, %s1346_s28  ;;  %p226_p2 = scmp.eq.s32.totalorder %s919_s13, 5 }
   0x9   : > { %s1784_s15 = smov (%p31_p0, %s30_s15), 0  ;;  %s1786_s16 = smov (!%p31_p0, %s33_s16), %s1366_s11 }
   0xa   : > { %1771 = sst [smem:[#allocation7_spill]] %s1784_s15  ;;  %p1472_p3 = por %p226_p2, %p225_p1 }
   0xb   : > { %p231_p4 = scmp.ne.s32.totalorder %s1346_s28, %s1342_s27  ;;  %p35_p5 = scmp.ge.s32.totalorder %s1786_s16, 2 }
   0xc   : > { %p232_p6 = scmp.eq.s32.totalorder %s920_s14, 5  ;;  %p923_p7 = scmp.ge.s32.totalorder %s1370_s12, 1 }
   0xd   : > { %p284_p8 = scmp.lt.s32.totalorder %s1370_s12, 7  ;;  %s1788_s16 = smov (%p35_p5, %s1786_s16), 0 }
   0xe   : > { %1773 = sst [smem:[#allocation8_spill]] %s1788_s16  ;;  %p1482_p9 = por %p232_p6, %p231_p4 }
   0xf   : > { %p285_p10 = pnand %p923_p7, %p284_p8  ;;  %s212_s19 = ssub.s32 %s1366_s11, %s1788_s16 }
  0x10   : > { %s215_s20 = sadd.s32 1, %s1350_s29  ;;  %p213_p11 = scmp.eq.s32.totalorder %s212_s19, 0 }
  0x11   : > { %288 = sbr.rel (%p285_p10) target bundleno = 790 (0x316), region = 52  ;;  %s319_s22 = sand.u32 (!%p285_p10), 1, %s1346_s28  }
  0x12   : > { %s1490_s21 = scalar_select %p213_p11, %s1350_s29, %s215_s20  }
  0x13   : > { %s321_s23 = smul.u32 (!%p285_p10), 12, %s1354_s30  ;;  %p322_p12 = scmp.lt.s32.totalorder (!%p285_p10), %s1358_s9, 1 }
  0x14   : > { %s1503_s20 = scalar_lea.vmem (!%p285_p10), [#allocation3], %s319_s22  ;;  %p925_p0 = scmp.ne.s32.totalorder (!%p285_p10), %s1354_s30, 0 }
  0x15   : > { %p324_p13 = scmp.lt.s32.totalorder (!%p285_p10), %s321_s23, 35 }
  0x18   : > { %s323_s24 = scalar_select %p322_p12, %s1358_s9, 1 }
  0x19   : > { %s1790_s23 = smov (!%p324_p13, %s321_s23), 35  ;;  %335 = sbr.rel (%p925_p0) target bundleno = 32 (0x20), region = 56 }
  0x1a   : > { %s1139_s25 = smul.u32 36, %s323_s24  ;;  %v1372_v0 = vmov (!%p925_p0), 0.0  }
  0x1b   : > { %336 = vst [vmem:[#allocation2] sm:$0x1] (!%p925_p0), %v1372_v0 }
  0x1c   : > { %s327_s26 = sadd.s32 %s1139_s25, %s1790_s23 }
  0x1d   : > { %s924_s13 = sshll.u32 %s327_s26, 2 }
  0x1e   : > { %s1499_s19 = scalar_lea.vmem %s1759_s0, %s924_s13 }
  0x20 PF: > { %v1216_v1 = vld [vmem:[%s1760_s1] sm:$0xff]   ;;  %vm413_vm0 = vcmask 1044480   ;;  %v1217_v2 = vld [vmem:[%s1760_s1 + $0x8] sm:$0x3f]   ;;  %vm414_vm1 = vcmask 1045504   ;;  %v1373_v3 = vmov 65535  }
  0x21   : > { %1001 = vmatprep.subr.bf16.mxu0 %v1216_v1  ;;  %1135 = vmatprep.subr.bf16.mxu1 %v1216_v1  ;;  %v415_v4 = vsel %vm413_vm0, 4294967295, %v1373_v3  ;;  %v1218_v5 = vld [vmem:[%s1499_s19] sm:$0xff]   ;;  %vm394_vm2 = vcmask 220160   ;;  %v1219_v6 = vld [vmem:[%s1499_s19 + $0x10] sm:$0xff]   ;;  %v1220_v9 = vld [vmem:[%s1499_s19 + $0x8] sm:$0xff]   ;;  %p954_p1 = scmp.ne.s32.totalorder %s1354_s30, 2 }
  0x22   : > { %1002 = vmatpush3.bf16.msra.mxu0 %v1216_v1  ;;  %1137 = vmatpush3.bf16.msra.mxu1 %v1216_v1  ;;  %v416_v7 = vsel %vm414_vm1, %v415_v4, 0  ;;  %v1221_v10 = vld [vmem:[%s1499_s19 + $0x18] sm:$0xff]   ;;  %v1222_v11 = vld [vmem:[%s1499_s19 + $0x20] sm:$0xff]   ;;  %v1223_v12 = vld [vmem:[%s1499_s19 + $0x28] sm:$0xff]   ;;  %vm1375_vm3 = vmmov (!%p954_p1), 0  }
  0x23   : > { %v418_v8 = vand.u32 %v1217_v2, %v416_v7  ;;  %1005 = vmatprep.mubr.msk.bf16.mxu0 %vm394_vm2, %v1218_v5  ;;  %1009 = vmatprep.mubr.msk.bf16.mxu1 %vm394_vm2, %v1219_v6  ;;  %v940_v13 = vld [vmem:[%s1761_s2] ss:$0 sm:$0xff] }
  0x24   : > { %v941_v15 = vld [vmem:[%s1762_s3] ss:$0 sm:$0xff] }
  0x25   : > { %1003 = vmatprep.subr.bf16.mxu0 %v418_v8  ;;  %1136 = vmatprep.subr.bf16.mxu1 %v418_v8 }
  0x26   : > { %1004 = vmatpush3.bf16.msra.mxu0 %v418_v8  ;;  %1138 = vmatpush3.bf16.msra.mxu1 %v418_v8 }
  0x29   : > { %1006 = vmatmul.mubr.msk.bf16.vlgmr.msra.gmra.mrb[0].mxu0 %vm394_vm2, %v1220_v9  ;;  %1010 = vmatmul.mubr.msk.bf16.vlgmr.msra.gmra.mrb[0].mxu1 %vm394_vm2, %v1221_v10 }
  0x2a   : > { %1013 = vmatprep.mubr.msk.bf16.mxu1 %vm394_vm2, %v1222_v11 }
  0x31   : > { %1014 = vmatmul.mubr.msk.bf16.gmra.mrb[4].mxu1 %vm394_vm2, %v1223_v12 }
  0xfc   : > { %v1007_v14 = vpop.f32.mrb[0].mxu0  ;;  %v1011_v16 = vpop.f32.mrb[0].mxu1 }
  0xfd   : > { %v510_v17 = vmul.f32 %v1007_v14, %v940_v13  ;;  %v454_v18 = vpop.f32.mrb[1].mxu0  ;;  %v470_v19 = vpop.f32.mrb[1].mxu1  ;;  %v514_v33 = vmul.f32 %v1011_v16, %v940_v13 }
  0xfe   : > { %v508_v20 = vmul.f32 %v940_v13, %v454_v18  ;;  %v512_v21 = vmul.f32 %v940_v13, %v470_v19  ;;  %v1008_v22 = vpop.f32.mrb[2].mxu0  ;;  %v1012_v23 = vpop.f32.mrb[2].mxu1 }
  0xff   : > { %v1530_v24 = vadd.f32 %v941_v15, %v510_v17  ;;  %v511_v25 = vmul.f32 %v1008_v22, %v940_v13  ;;  %v457_v26 = vpop.f32.mrb[3].mxu0  ;;  %v473_v27 = vpop.f32.mrb[3].mxu1  ;;  %v515_v38 = vmul.f32 %v1012_v23, %v940_v13  ;;  %v1546_v42 = vadd.f32 %v941_v15, %v514_v33 }
 0x100   : > { %v1532_v28 = vadd.f32 %v941_v15, %v508_v20  ;;  %v1534_v29 = vadd.f32 %v941_v15, %v512_v21  ;;  %v509_v30 = vmul.f32 %v940_v13, %v457_v26  ;;  %v513_v31 = vmul.f32 %v940_v13, %v473_v27 }
 0x101   : > { %v944_v32 = vmul.f32 -1.442695, %v1530_v24  ;;  %v1537_v34 = vadd.f32 %v941_v15, %v511_v25  ;;  %v1549_v48 = vadd.f32 %v941_v15, %v515_v38  ;;  %v948_v52 = vmul.f32 -1.442695, %v1546_v42 }
 0x102   : > { %v942_v35 = vmul.f32 -1.442695, %v1532_v28  ;;  %v1540_v36 = vadd.f32 %v941_v15, %v509_v30  ;;  %v1543_v39 = vadd.f32 %v941_v15, %v513_v31  ;;  %v946_v40 = vmul.f32 -1.442695, %v1534_v29 }
 0x103   : > { %v945_v37 = vmul.f32 -1.442695, %v1537_v34  ;;  %1224 = vpow2.f32 %v944_v32  ;;  %v949_v55 = vmul.f32 -1.442695, %v1549_v48 }
 0x104   : > { %v1015_v41 = vpop.f32.mrb[4].mxu1  ;;  %1226 = vpow2.f32 %v942_v35  ;;  %v943_v43 = vmul.f32 -1.442695, %v1540_v36  ;;  %v947_v49 = vmul.f32 -1.442695, %v1543_v39 }
 0x105   : > { %v486_v44 = vpop.f32.mrb[5].mxu1  ;;  %v518_v45 = vmul.f32 %v1015_v41, %v940_v13  ;;  %1228 = vpow2.f32 %v945_v37 }
 0x106   : > { %v516_v46 = vmul.f32 %v940_v13, %v486_v44  ;;  %v1016_v47 = vpop.f32.mrb[6].mxu1  ;;  %1230 = vpow2.f32 %v946_v40 }
 0x107   : > { %v489_v50 = vpop.f32.mrb[7].mxu1  ;;  %1232 = vpow2.f32 %v943_v43  ;;  %v1555_v54 = vadd.f32 %v941_v15, %v518_v45  ;;  %v519_v56 = vmul.f32 %v1016_v47, %v940_v13 }
 0x108   : > { %v517_v51 = vmul.f32 %v940_v13, %v489_v50  ;;  %v1553_v53 = vadd.f32 %v941_v15, %v516_v46  ;;  %1234 = vpow2.f32 %v947_v49 }
 0x109   : > { %1236 = vpow2.f32 %v948_v52  ;;  %v952_v60 = vmul.f32 -1.442695, %v1555_v54  ;;  %v1562_v62 = vadd.f32 %v941_v15, %v519_v56 }
 0x10a   : > { %v1558_v57 = vadd.f32 %v941_v15, %v517_v51  ;;  %v950_v58 = vmul.f32 -1.442695, %v1553_v53  ;;  %1238 = vpow2.f32 %v949_v55 }
 0x10b   : > { %v953_v5 = vmul.f32 -1.442695, %v1562_v62 }
 0x10c   : > { %v951_v63 = vmul.f32 -1.442695, %v1558_v57  ;;  %1240 = vpow2.f32 %v950_v58 }
 0x10d   : > { %v1225_v59 = vpop.eup %1224  ;;  %1242 = vpow2.f32 %v952_v60 }
 0x10e   : > { %v1227_v61 = vpop.eup %1226  ;;  %v577_v2 = vadd.f32 1.0, %v1225_v59  ;;  %1244 = vpow2.f32 %v951_v63 }
 0x10f   : > { %v575_v0 = vadd.f32 1.0, %v1227_v61  ;;  %v1229_v1 = vpop.eup %1228 }
 0x110   : > { %v1231_v3 = vpop.eup %1230  ;;  %v578_v6 = vadd.f32 1.0, %v1229_v1 }
 0x111   : > { %v1233_v4 = vpop.eup %1232  ;;  %1246 = vrcp.f32 %v575_v0  ;;  %v579_v9 = vadd.f32 1.0, %v1231_v3  ;;  %v623_v3 = vld [vmem:[#allocation2] sm:$0x1] }
 0x112   : > { %v576_v7 = vadd.f32 1.0, %v1233_v4  ;;  %v1235_v8 = vpop.eup %1234  ;;  %1248 = vrcp.f32 %v577_v2 }
 0x113   : > { %v1237_v10 = vpop.eup %1236  ;;  %v580_v11 = vadd.f32 1.0, %v1235_v8  ;;  %v1376_v8 = vmov (!%p954_p1), 0.0  }
 0x114   : > { %1250 = vrcp.f32 %v576_v7  ;;  %v1239_v12 = vpop.eup %1238  ;;  %v581_v13 = vadd.f32 1.0, %v1237_v10  ;;  %v662_v7 = vld [vmem:[%s1763_s4 + $0x18] sm:$0xff] (!%p954_p1)  ;;  %1049 = vmatprep.mubr.msk.f32.mxu0 (!%p954_p1), %vm1375_vm3, %v1376_v8  ;;  %1084 = vmatprep.mubr.msk.f32.mxu1 (!%p954_p1), %vm1375_vm3, %v1376_v8  ;;  %v663_v10 = vld [vmem:[%s1763_s4 + $0x20] sm:$0xff] (!%p954_p1) }
 0x115   : > { %1252 = vpow2.f32 %v953_v5  ;;  %v582_v16 = vadd.f32 1.0, %v1239_v12  ;;  %v1374_v5 = vmov (!%p954_p1), 0.0|0.0   ;;  %v1603_v12 = vld [vmem:[%s1762_s3] sm:$0x1] (!%p954_p1) }
 0x116   : > { %1254 = vrcp.f32 %v578_v6  ;;  %v1241_v14 = vpop.eup %1240  ;;  %1087 = vmatprep.subr.bf16.mxu0 (!%p954_p1), %v1374_v5  ;;  %1111 = vmatprep.subr.bf16.mxu1 (!%p954_p1), %v1374_v5 }
 0x117   : > { %1256 = vrcp.f32 %v579_v9  ;;  %v1243_v15 = vpop.eup %1242  ;;  %v583_v19 = vadd.f32 1.0, %v1241_v14  ;;  %v746_v14 = vld [vmem:[%s1765_s6] sm:$0xff] (!%p954_p1) }
 0x118   : > { %1258 = vrcp.f32 %v580_v11  ;;  %v1245_v17 = vpop.eup %1244  ;;  %v585_v30 = vadd.f32 1.0, %v1243_v15  ;;  %v664_v11 = vld [vmem:[%s1763_s4 + $0x28] sm:$0xff] (!%p954_p1) }
 0x119   : > { %1260 = vrcp.f32 %v581_v13  ;;  %v584_v22 = vadd.f32 1.0, %v1245_v17  ;;  %v955_v13 = vmul.f32 (!%p954_p1), -1.442695, %v1603_v12  ;;  %v747_v15 = vld [vmem:[%s1765_s6 + $0x8] sm:$0xff] (!%p954_p1)  ;;  %v1094_v17 = vpack.c.bf16 (!%p954_p1), %v664_v11, %v663_v10 }
 0x11a   : > { %1262 = vrcp.f32 %v582_v16  ;;  %v748_v16 = vld [vmem:[%s1765_s6 + $0x10] sm:$0xff] (!%p954_p1) }
 0x11b   : > { %v1247_v18 = vpop.eup %1246  ;;  %1264 = vrcp.f32 %v583_v19  ;;  %v749_v19 = vld [vmem:[%s1765_s6 + $0x18] sm:$0xff] (!%p954_p1) }
 0x11c   : > { %v1249_v20 = vpop.eup %1248  ;;  %v611_v25 = vmul.f32 %v1247_v18, %v1532_v28  ;;  %1266 = vrcp.f32 %v584_v22  ;;  %v1112_v18 = vpack.c.bf16 (!%p954_p1), %v747_v15, %v746_v14  ;;  %v1115_v22 = vpack.c.bf16 (!%p954_p1), %v749_v19, %v748_v16 }
 0x11d   : > { %v613_v31 = vmul.f32 %v1249_v20, %v1530_v24  ;;  %1268 = vrcp.f32 %v585_v30  ;;  %v665_v20 = vld [vmem:[%s1763_s4 + $0x30] sm:$0xff] (!%p954_p1)  ;;  %v668_v30 = vld [vmem:[%s1763_s4 + $0x48] sm:$0xff] (!%p954_p1) }
 0x11e   : > { %v1251_v21 = vpop.eup %1250  ;;  %1113 = vmatpush3.bf16.msra.mxu1 (!%p954_p1), %v1112_v18 }
 0x11f   : > { %v1253_v23 = vpop.eup %1252  ;;  %v612_v26 = vmul.f32 %v1251_v21, %v1540_v36  ;;  %v666_v21 = vld [vmem:[%s1763_s4 + $0x38] sm:$0xff] (!%p954_p1)  ;;  %1114 = vmatprep.subr.bf16.mxu1 (!%p954_p1), %v1374_v5 }
 0x120   : > { %v1255_v27 = vpop.eup %1254  ;;  %v586_v35 = vadd.f32 1.0, %v1253_v23  ;;  %v750_v23 = vld [vmem:[%s1765_s6 + $0x20] sm:$0xff] (!%p954_p1) }
 0x121   : > { %v624_v32 = vadd.f32 %v612_v26, %v611_v25  ;;  %v1257_v33 = vpop.eup %1256  ;;  %v614_v37 = vmul.f32 %v1255_v27, %v1537_v34  ;;  %v751_v25 = vld [vmem:[%s1765_s6 + $0x28] sm:$0xff] (!%p954_p1)  ;;  %v1097_v26 = vpack.c.bf16 (!%p954_p1), %v666_v21, %v665_v20  ;;  %v667_v27 = vld [vmem:[%s1763_s4 + $0x40] sm:$0xff] (!%p954_p1) }
 0x122   : > { %v1259_v40 = vpop.eup %1258  ;;  %v615_v41 = vmul.f32 %v1257_v33, %v1534_v29  ;;  %1270 = vrcp.f32 %v586_v35  ;;  %1116 = vmatpush3.bf16.msra.mxu1 (!%p954_p1), %v1115_v22  ;;  %v753_v33 = vld [vmem:[%s1765_s6 + $0x38] sm:$0xff] (!%p954_p1)  ;;  %v1100_v35 = vpack.c.bf16 (!%p954_p1), %v668_v30, %v667_v27 }
 0x123   : > { %v625_v38 = vadd.f32 %v624_v32, %v613_v31  ;;  %v1261_v28 = vpop.eup %1260  ;;  %v616_v36 = vmul.f32 %v1259_v40, %v1543_v39  ;;  %1272 = vpow2.f32 (!%p954_p1), %v955_v13  ;;  %v1118_v31 = vpack.c.bf16 (!%p954_p1), %v751_v25, %v750_v23  ;;  %1117 = vmatprep.subr.bf16.mxu1 (!%p954_p1), %v1374_v5  ;;  %v752_v32 = vld [vmem:[%s1765_s6 + $0x30] sm:$0xff] (!%p954_p1) }
 0x124   : > { %v1263_v45 = vpop.eup %1262  ;;  %v617_v24 = vmul.f32 %v1261_v28, %v1546_v42  ;;  %v1121_v40 = vpack.c.bf16 (!%p954_p1), %v753_v33, %v752_v32  ;;  %v755_v28 = vld [vmem:[%s1765_s6 + $0x48] sm:$0xff] (!%p954_p1) }
 0x125   : > { %v626_v43 = vadd.f32 %v625_v38, %v614_v37  ;;  %v1265_v47 = vpop.eup %1264  ;;  %v618_v49 = vmul.f32 %v1263_v45, %v1549_v48  ;;  %v669_v37 = vld [vmem:[%s1763_s4 + $0x50] sm:$0xff] (!%p954_p1)  ;;  %v670_v38 = vld [vmem:[%s1763_s4 + $0x58] sm:$0xff] (!%p954_p1)  ;;  %v671_v45 = vld [vmem:[%s1763_s4 + $0x60] sm:$0xff] (!%p954_p1) }
 0x126   : > { %v1267_v34 = vpop.eup %1266  ;;  %v619_v51 = vmul.f32 %v1265_v47, %v1553_v53  ;;  %1119 = vmatpush3.bf16.msra.mxu1 (!%p954_p1), %v1118_v31  ;;  %v756_v47 = vld [vmem:[%s1765_s6 + $0x50] sm:$0xff] (!%p954_p1) }
 0x127   : > { %v627_v44 = vadd.f32 %v626_v43, %v615_v41  ;;  %v1269_v55 = vpop.eup %1268  ;;  %v620_v56 = vmul.f32 %v1267_v34, %v1558_v57  ;;  %v660_v57 = vld [vmem:[%s1763_s4 + $0x8] sm:$0xff] (!%p954_p1)  ;;  %1120 = vmatprep.subr.bf16.mxu1 (!%p954_p1), %v1374_v5  ;;  %v754_v43 = vld [vmem:[%s1765_s6 + $0x40] sm:$0xff] (!%p954_p1)  ;;  %v673_v34 = vld [vmem:[%s1763_s4 + $0x70] sm:$0xff] (!%p954_p1) }
 0x128   : > { %v621_v39 = vmul.f32 %v1269_v55, %v1555_v54  ;;  %v659_v54 = vld [vmem:[%s1763_s4] sm:$0xff] (!%p954_p1) }
 0x129   : > { %v628_v46 = vadd.f32 %v627_v44, %v616_v36  ;;  %v1088_v6 = vpack.c.bf16 (!%p954_p1), %v660_v57, %v659_v54  ;;  %v1103_v36 = vpack.c.bf16 (!%p954_p1), %v670_v38, %v669_v37  ;;  %v758_v55 = vld [vmem:[%s1765_s6 + $0x60] sm:$0xff] (!%p954_p1) }
 0x12a   : > { %1122 = vmatpush3.bf16.msra.mxu1 (!%p954_p1), %v1121_v40  ;;  %v762_v54 = vld [vmem:[%s1766_s7] sm:$0x1] (!%p954_p1) }
 0x12b   : > { %v629_v50 = vadd.f32 %v628_v46, %v617_v24  ;;  %1089 = vmatpush3.bf16.msra.mxu0 (!%p954_p1), %v1088_v6  ;;  %v672_v24 = vld [vmem:[%s1763_s4 + $0x68] sm:$0xff] (!%p954_p1)  ;;  %v1124_v46 = vpack.c.bf16 (!%p954_p1), %v755_v28, %v754_v43  ;;  %1123 = vmatprep.subr.bf16.mxu1 (!%p954_p1), %v1374_v5 }
 0x12c   : > { %v1271_v58 = vpop.eup %1270  ;;  %1090 = vmatprep.subr.bf16.mxu0 (!%p954_p1), %v1374_v5 }
 0x12d   : > { %v630_v52 = vadd.f32 %v629_v50, %v618_v49  ;;  %v622_v60 = vmul.f32 %v1271_v58, %v1562_v62  ;;  %v661_v62 = vld [vmem:[%s1763_s4 + $0x10] sm:$0xff] (!%p954_p1)  ;;  %v1273_v41 = vpop.eup (!%p954_p1), %1272  ;;  %v757_v49 = vld [vmem:[%s1765_s6 + $0x58] sm:$0xff] (!%p954_p1)  ;;  %v1106_v50 = vpack.c.bf16 (!%p954_p1), %v672_v24, %v671_v45 }
 0x12e   : > { %v1091_v9 = vpack.c.bf16 (!%p954_p1), %v662_v7, %v661_v62  ;;  %v652_v44 = vadd.f32 (!%p954_p1), 1.0, %v1273_v41  ;;  %1125 = vmatpush3.bf16.msra.mxu1 (!%p954_p1), %v1124_v46 }
 0x12f   : > { %v631_v29 = vadd.f32 %v630_v52, %v619_v51  ;;  %v674_v51 = vld [vmem:[%s1763_s4 + $0x78] sm:$0xff] (!%p954_p1)  ;;  %v1127_v52 = vpack.c.bf16 (!%p954_p1), %v757_v49, %v756_v47  ;;  %1126 = vmatprep.subr.bf16.mxu1 (!%p954_p1), %v1374_v5 }
 0x130   : > { %1092 = vmatpush3.bf16.msra.mxu0 (!%p954_p1), %v1091_v9  ;;  %1274 = vrcp.f32 (!%p954_p1), %v652_v44 }
 0x131   : > { %v632_v59 = vadd.f32 %v631_v29, %v620_v56  ;;  %1093 = vmatprep.subr.bf16.mxu0 (!%p954_p1), %v1374_v5  ;;  %v759_v29 = vld [vmem:[%s1765_s6 + $0x68] sm:$0xff] (!%p954_p1)  ;;  %v1109_v56 = vpack.c.bf16 (!%p954_p1), %v674_v51, %v673_v34 }
 0x132   : > { %1128 = vmatpush3.bf16.msra.mxu1 (!%p954_p1), %v1127_v52  ;;  %v1130_v58 = vpack.c.bf16 (!%p954_p1), %v759_v29, %v758_v55 }
 0x133   : > { %v633_v42 = vadd.f32 %v632_v59, %v621_v39  ;;  %1129 = vmatprep.subr.bf16.mxu1 (!%p954_p1), %v1374_v5 }
 0x134   : > { %1095 = vmatpush3.bf16.msra.mxu0 (!%p954_p1), %v1094_v17 }
 0x135   : > { %v634_v61 = vadd.f32 %v633_v42, %v622_v60  ;;  %1096 = vmatprep.subr.bf16.mxu0 (!%p954_p1), %v1374_v5 }
 0x136   : > { %1131 = vmatpush3.bf16.msra.mxu1 (!%p954_p1), %v1130_v58 }
 0x137   : > { %v635_v63 = vrot.slane %v634_v61, 4  ;;  %1132 = vmatprep.subr.bf16.mxu1 (!%p954_p1), %v1374_v5 }
 0x138   : > { %1098 = vmatpush3.bf16.msra.mxu0 (!%p954_p1), %v1097_v26 }
 0x139   : > { %v636_v0 = vadd.f32 %v635_v63, %v634_v61  ;;  %1099 = vmatprep.subr.bf16.mxu0 (!%p954_p1), %v1374_v5 }
 0x13a   : > { %v1275_v39 = vpop.eup (!%p954_p1), %1274 }
 0x13b   : > { %v637_v48 = vrot.slane %v636_v0, 2  ;;  %v655_v59 = vmul.f32 (!%p954_p1), %v1275_v39, %v1603_v12 }
 0x13c   : > { %1101 = vmatpush3.bf16.msra.mxu0 (!%p954_p1), %v1100_v35 }
 0x13d   : > { %v638_v1 = vadd.f32 %v637_v48, %v636_v0  ;;  %1102 = vmatprep.subr.bf16.mxu0 (!%p954_p1), %v1374_v5  ;;  %v656_v42 = vmul.f32 (!%p954_p1), 32.0, %v655_v59  ;;  %v760_v0 = vld [vmem:[%s1765_s6 + $0x70] sm:$0xff] (!%p954_p1)  ;;  %v761_v48 = vld [vmem:[%s1765_s6 + $0x78] sm:$0xff] (!%p954_p1) }
 0x13f   : > { %v639_v2 = vrot.slane %v638_v1, 1  ;;  %646 = sbr.rel (%p954_p1) target bundleno = 766 (0x2fe), region = 60 }
 0x140   : > { %1104 = vmatpush3.bf16.msra.mxu0 (!%p954_p1), %v1103_v36 }
 0x141   : > { %v640_v53 = vadd.f32 %v639_v2, %v638_v1  ;;  %1105 = vmatprep.subr.bf16.mxu0 (!%p954_p1), %v1374_v5  ;;  %v1133_v1 = vpack.c.bf16 (!%p954_p1), %v761_v48, %v760_v0  ;;  %v675_v2 = vld [vmem:[%s1764_s5] sm:$0x1] (!%p954_p1) }
 0x143   : > { %v641_v4 = vadd.f32 %v640_v53, %v623_v3  ;;  %1134 = vmatpush3.bf16.msra.mxu1 (!%p954_p1), %v1133_v1 }
 0x144   : > { %1107 = vmatpush3.bf16.msra.mxu0 (!%p954_p1), %v1106_v50 }
 0x145   : > { %642 = vst [vmem:[#allocation2] sm:$0x1] %v641_v4  ;;  %1108 = vmatprep.subr.bf16.mxu0 (!%p954_p1), %v1374_v5 }
 0x148   : > { %1110 = vmatpush3.bf16.msra.mxu0 %v1109_v56 }
 0x14c   : > { %v647_v60 = vld [vmem:[#allocation2] sm:$0x1] }
 0x14d   : > { %v657_v61 = vsub.f32 %v647_v60, %v656_v42 }
 0x14f   : > { %v658_v63 = vmul.f32 0.00390625, %v657_v61 }
 0x151   : > { %1050 = vmatmul.mubr.f32.vlgmr.msra.gmra.mrb[0].mxu0 %v658_v63 }
 0x224   : > { %v742_v3 = vpop.f32.mrb[0].mxu0 }
 0x225   : > { %v743_v53 = vadd.f32 %v742_v3, %v675_v2  ;;  %v1051_v4 = vpop.f32.mrb[1].mxu0 }
 0x227   : > { %1085 = vmatmul.mubr.f32.vlgmr.msra.gmra.mrb[0].mxu1 %v743_v53 }
 0x2fa   : > { %v829_v57 = vpop.f32.mrb[0].mxu1 }
 0x2fb   : > { %v830_v62 = vadd.f32 %v829_v57, %v762_v54  ;;  %v1086_v5 = vpop.f32.mrb[1].mxu1 }
 0x2fd   : > { %833 = vst [vmem:[%s1503_s20] sm:$0x1] %v830_v62 }
 0x2fe PF: > { %s956_s23 = sshll.u32 %s1358_s9, 4  ;;  %s847_s30 = sshll.u32 %s1503_s20, 4  ;;  %s848_s30 = int_to_ptr.vmem [resolvable:$true] %s847_s30 }
 0x2ff   : > { %s1709_s15 = scalar_lea.hbm %s1767_s8, %s956_s23  ;;  %s835_s24 = scalar_lea.sflag [#allocation4], %s319_s22 }
 0x300   : > { %s1276_s25 = scalar_lea.vmem %s848_s30, 16  ;;  %s1377_s26 = smov [#allocation3]  }
 0x301   : > { %p1277_p2 = scmp.ne.s32.totalorder %s848_s30, %s1276_s25  ;;  %s1280_s13 = sshll.u32 %s1377_s26, 4  ;;  %s1281_s13 = int_to_ptr.vmem [resolvable:$false] %s1280_s13 }
 0x302   : > { %s1282_s14 = scalar_lea.vmem %s1281_s13, 32  ;;  %p1283_p6 = scmp.lt.s32.totalorder %s848_s30, %s1281_s13 }
 0x303   : > { %p1278_p4 = pnand %p1277_p2, %p1472_p3  ;;  %p1284_p7 = scmp.lt.s32.totalorder %s1282_s14, %s1276_s25 }
 0x305   : > { %p1279_p5 = pneg %p1278_p4  ;;  %p1285_p8 = por %p1284_p7, %p1283_p6 }
 0x307   : > { %p1286_p10 = pnand %p1285_p8, %p1279_p5 }
 0x309   : > { %1289 = shalt.err (!%p1286_p10)
}
 0x30a   : > { %s1290_s9 = scalar_lea.hbm %s1709_s15, 16  ;;  %s1294_s19 = scalar_lea.hbm %s1767_s8, 32 }
 0x30b   : > { %p1291_p11 = scmp.ne.s32.totalorder %s1709_s15, %s1290_s9  ;;  %p1295_p0 = scmp.lt.u32.totalorder %s1709_s15, %s1767_s8 }
 0x30c   : > { %p1296_p1 = scmp.lt.u32.totalorder %s1294_s19, %s1290_s9  ;;  %p1298_p4 = scmp.lt.u32.totalorder %s1290_s9, %s1709_s15 }
 0x30d   : > { %p1292_p12 = pnand %p1291_p11, %p1472_p3 }
 0x30e   : > { %p1297_p2 = por %p1296_p1, %p1295_p0 }
 0x30f   : > { %p1293_p13 = pneg %p1292_p12 }
 0x310   : > { %p1299_p5 = por %p1298_p4, %p1297_p2 }
 0x312   : > { %p1300_p6 = pnand %p1299_p5, %p1293_p13 }
 0x314   : > { %1303 = shalt.err (!%p1300_p6)
}
 0x315   : > { %1140 = dma.vmem_to_hbm [thread:$0]  (%p1472_p3), %s848_s30, 16, %s1709_s15, %s835_s24  }
 0x316 PF: > { %p1146_p7 = scmp.ge.s32.totalorder %s1370_s12, 2  ;;  %s859_s11 = sand.u32 1, %s1342_s27  }
 0x317   : > { %s860_s25 = scalar_lea.sflag [#allocation4], %s859_s11 }
 0x318   : > { %p1143_p8 = pnand %p1146_p7, %p1482_p9 }
 0x31a   : > { %1337 = dma.done.wait (!%p1143_p8), %s860_s25, 16  }
 0x31b   : > { %1339 = vsyncadd (!%p1143_p8), %s860_s25, 4294967280  ;;  %s21_s12 = sadd.s32 1, %s1370_s12   ;;  %s1775_s9 = sld [smem:[#allocation6_spill]] }
 0x31c   : > { %p18_p10 = scmp.ge.s32.totalorder %s21_s12, 8   ;;  %s1776_s17 = sld [smem:[#allocation7_spill]] }
 0x31d   : > { %s1777_s11 = sld [smem:[#allocation8_spill]]  ;;  %s1778_s27 = smov %s1346_s28 }
 0x31e   : > { %s1779_s28 = smov %s1350_s29  ;;  %s1780_s29 = smov %s1490_s21 }
 0x31f   : > { %s1781_s30 = smov %s1362_s10  ;;  %20 = sbr.rel (!%p18_p10) target bundleno = 5 (0x5), region = 95 }
 0x322   : > { %s1782_s10 = smov %s1776_s17 }
 0x326   :  { %864 = vsyncpa [#allocation4], 1 }
 0x327   :  { %866 = vsyncpa [#allocation4 + $0x1], 1 }

</bundles_post_ra>
